<compile_context>
chip_gen: v6e
topology: v6e:2x2x1
jax: 0.10.0
libtpu: 0.0.40
codegen_flags: <defaults>
</compile_context>

<pallas_src>
import jax
import jax.numpy as jnp
import numpy as np
from jax.experimental import pallas as pl
from jax.experimental.pallas import tpu as pltpu


def _round_up(x, m):
    return ((x + m - 1) // m) * m


def _choose_tb(batch, target):
    """Batch-tile size: as close to `target` as possible while keeping >=2
    grid steps (megacore) and dividing the batch evenly."""
    tb = max(1, min(target, batch // 2 if batch >= 2 else 1))
    while batch % tb:
        tb -= 1
    return max(tb, 1)


# ----------------------------------------------------------------------------
# Fused kernel: per batch tile, compute both FC projections + bilinear logits
# entirely in VMEM and store the (h_out, Nv, Nq) layout directly.
# ----------------------------------------------------------------------------
def bcnet_fused_kernel(v_ref, q_ref, wv_ref, bv_ref, wq_ref, bq_ref,
                       hmat_ref, hbias_ref, o_ref):
    # v_ref: (TB, Nvp, v_dim) bf16     q_ref: (TB, Nqp, q_dim) bf16
    # wv_ref: (v_dim, Dp) bf16         bv_ref: (1, Dp) f32
    # wq_ref: (q_dim, Dp) bf16         bq_ref: (1, Dp) f32
    # hmat_ref: (h_out, Dp) f32        hbias_ref: (h_out, 1) f32
    # o_ref: (TB, h_out, Nvp, Nqp) f32
    wv = wv_ref[...]
    wq = wq_ref[...]
    bv = bv_ref[...]
    bq = bq_ref[...]
    hm = hmat_ref[...]
    hb = hbias_ref[...]

    tb = v_ref.shape[0]
    h_out = hm.shape[0]

    # TB and h_out are small compile-time constants -> static unroll is fine.
    for b in range(tb):
        # FC projections (f32 accumulation, ReLU in f32).
        vp = jnp.maximum(
            jnp.dot(v_ref[b], wv, preferred_element_type=jnp.float32) + bv, 0.0)
        qp = jnp.maximum(
            jnp.dot(q_ref[b], wq, preferred_element_type=jnp.float32) + bq, 0.0)
        vpb = vp.astype(jnp.bfloat16)                              # (Nvp, Dp)
        for g in range(h_out):
            # Scale the smaller operand (q_proj) by this glimpse's h_mat row
            # in f32, cast once just before the MXU.
            qh = (qp * hm[g][None, :]).astype(jnp.bfloat16)        # (Nqp, Dp)
            lg = jax.lax.dot_general(
                vpb, qh,
                dimension_numbers=(((1,), (1,)), ((), ())),        # contract Dp
                preferred_element_type=jnp.float32)                # (Nvp, Nqp)
            o_ref[b, g, :, :] = lg + hb[g]


def bcnet_forward(prep, v, q, *, tb_target=4):
    """Fused BCNet forward. `prep` comes from prepare_bcnet_params (one-time)."""
    B, Nv, v_dim = v.shape
    _, Nq, q_dim = q.shape
    Dp = prep["Wv_t"].shape[1]
    h_out = prep["h_mat"].shape[0]

    # Pad token axes: Nq -> multiple of 16 (bf16 sublane packing), Nv -> 8.
    Nvp = _round_up(Nv, 8)
    Nqp = _round_up(Nq, 16)
    if Nvp != Nv:
        v = jnp.pad(v, ((0, 0), (0, Nvp - Nv), (0, 0)))
    if Nqp != Nq:
        q = jnp.pad(q, ((0, 0), (0, Nqp - Nq), (0, 0)))
    vb = v.astype(jnp.bfloat16)
    qb = q.astype(jnp.bfloat16)

    tb = _choose_tb(B, tb_target)
    grid_b = B // tb

    # VMEM budget: resident (grid-invariant) weights + double-buffered
    # streamed tiles + headroom; clamp below v7x's 64 MiB per-core VMEM.
    resident = (v_dim * Dp * 2 + q_dim * Dp * 2        # Wv_t, Wq_t (bf16)
                + 2 * Dp * 4                           # bv, bq (f32)
                + h_out * Dp * 4 + h_out * 4)          # h_mat, h_bias (f32)
    streamed = tb * (Nvp * v_dim * 2 + Nqp * q_dim * 2   # v, q tiles (bf16)
                     + h_out * Nvp * Nqp * 4)             # logits tile (f32)
    vmem_limit = int(min(max(2 * resident + 2 * streamed + (8 << 20),
                             16 << 20), 56 << 20))

    out = pl.pallas_call(
        bcnet_fused_kernel,
        out_shape=jax.ShapeDtypeStruct((B, h_out, Nvp, Nqp), jnp.float32),
        grid=(grid_b,),
        in_specs=[
            pl.BlockSpec((tb, Nvp, v_dim), lambda i: (i, 0, 0)),   # v tile (pipelined)
            pl.BlockSpec((tb, Nqp, q_dim), lambda i: (i, 0, 0)),   # q tile (pipelined)
            pl.BlockSpec((v_dim, Dp), lambda i: (0, 0)),           # Wv^T, resident
            pl.BlockSpec((1, Dp), lambda i: (0, 0)),               # bv, resident
            pl.BlockSpec((q_dim, Dp), lambda i: (0, 0)),           # Wq^T, resident
            pl.BlockSpec((1, Dp), lambda i: (0, 0)),               # bq, resident
            pl.BlockSpec((h_out, Dp), lambda i: (0, 0)),           # h_mat, resident
            pl.BlockSpec((h_out, 1), lambda i: (0, 0)),            # h_bias, resident
        ],
        out_specs=pl.BlockSpec((tb, h_out, Nvp, Nqp), lambda i: (i, 0, 0, 0)),
        compiler_params=pltpu.CompilerParams(
            dimension_semantics=("parallel",),
            vmem_limit_bytes=vmem_limit),
    )(vb, qb, prep["Wv_t"], prep["bv"], prep["Wq_t"], prep["bq"],
      prep["h_mat"], prep["h_bias"])

    if Nvp != Nv or Nqp != Nq:
        out = out[:, :, :Nv, :Nq]
    return out


# ----------------------------------------------------------------------------
# One-time parameter preprocessing (hoisted out of the forward pass).
# ----------------------------------------------------------------------------
def prepare_bcnet_params(params):
    D = params["Wv"].shape[0]                 # h_dim * k
    Dp = _round_up(D, 128)                    # lane-dense hidden dim
    pad = Dp - D
    Wv_t = jnp.pad(params["Wv"], ((0, pad), (0, 0))).T.astype(jnp.bfloat16)  # (v_dim, Dp)
    Wq_t = jnp.pad(params["Wq"], ((0, pad), (0, 0))).T.astype(jnp.bfloat16)  # (q_dim, Dp)
    bv = jnp.pad(params["bv"], (0, pad)).reshape(1, Dp).astype(jnp.float32)
    bq = jnp.pad(params["bq"], (0, pad)).reshape(1, Dp).astype(jnp.float32)
    h_mat = jnp.pad(params["h_mat"], ((0, 0), (0, pad))).astype(jnp.float32)  # (h_out, Dp)
    h_bias = params["h_bias"].reshape(-1, 1).astype(jnp.float32)              # (h_out, 1)
    return dict(Wv_t=Wv_t, Wq_t=Wq_t, bv=bv, bq=bq, h_mat=h_mat, h_bias=h_bias)


# ----------------------------------------------------------------------------
# BCNet parameter setup (deterministic, synthetic) + reference forward.
# ----------------------------------------------------------------------------
def weight_norm_linear(key_v, key_g, key_b, in_dim, out_dim):
    """weight_norm(nn.Linear, dim=None): W = g * V / ||V||_F (g is a scalar)."""
    Vw = jax.random.normal(key_v, (out_dim, in_dim), jnp.float32) * 0.1
    g = jnp.abs(jax.random.normal(key_g, (), jnp.float32)) + 1.0
    W = g * Vw / jnp.linalg.norm(Vw)
    b = jax.random.normal(key_b, (out_dim,), jnp.float32) * 0.1
    return W, b


def make_bcnet_params(key, v_dim, q_dim, h_dim, h_out, k):
    D = h_dim * k
    ks = jax.random.split(key, 8)
    Wv, bv = weight_norm_linear(ks[0], ks[1], ks[2], v_dim, D)
    Wq, bq = weight_norm_linear(ks[3], ks[4], ks[5], q_dim, D)
    h_mat = jax.random.normal(ks[6], (h_out, D), jnp.float32)    # torch: (1,h_out,1,D).normal_()
    h_bias = jax.random.normal(ks[7], (h_out,), jnp.float32)     # torch: (1,h_out,1,1).normal_()
    return dict(Wv=Wv, bv=bv, Wq=Wq, bq=bq, h_mat=h_mat, h_bias=h_bias)


def reference_forward(params, v, q):
    vp = jax.nn.relu(v @ params["Wv"].T + params["bv"])
    qp = jax.nn.relu(q @ params["Wq"].T + params["bq"])
    logits = jnp.einsum("bid,gd,bjd->bgij", vp, params["h_mat"], qp)
    return logits + params["h_bias"].reshape(1, -1, 1, 1)


if __name__ == "__main__":
    B, Nv, Nq = 2, 16, 8
    v_dim, q_dim, h_dim, h_out, k = 32, 32, 32, 2, 3

    key = jax.random.PRNGKey(0)
    k_param, k_v, k_q = jax.random.split(key, 3)
    params = make_bcnet_params(k_param, v_dim, q_dim, h_dim, h_out, k)
    v = jax.random.normal(k_v, (B, Nv, v_dim), jnp.float32)
    q = jax.random.normal(k_q, (B, Nq, q_dim), jnp.float32)

    prep = jax.block_until_ready(prepare_bcnet_params(params))   # one-time cost
    logits = bcnet_forward(prep, v, q)
    logits = jax.block_until_ready(logits)

    ref = jax.block_until_ready(reference_forward(params, v, q))
    # bf16 matmul inputs -> looser tolerance against the f32 reference.
    np.testing.assert_allclose(np.asarray(logits), np.asarray(ref),
                               rtol=2e-2, atol=2e-2)
    assert logits.shape == (B, h_out, Nv, Nq)
    print("KERNEL_OK")
</pallas_src>

<mosaic_0001>
module attributes {stable_mosaic.version = 11 : i64} {
  func.func @bcnet_fused_kernel(%arg0: i32, %arg1: memref<1x16x32xbf16, #tpu.memory_space<vmem>>, %arg2: memref<1x16x32xbf16, #tpu.memory_space<vmem>>, %arg3: memref<32x128xbf16, #tpu.memory_space<vmem>>, %arg4: memref<1x128xf32, #tpu.memory_space<vmem>>, %arg5: memref<32x128xbf16, #tpu.memory_space<vmem>>, %arg6: memref<1x128xf32, #tpu.memory_space<vmem>>, %arg7: memref<2x128xf32, #tpu.memory_space<vmem>>, %arg8: memref<2x1xf32, #tpu.memory_space<vmem>>, %arg9: memref<1x2x16x16xf32, #tpu.memory_space<vmem>>) attributes {dimension_semantics = [#tpu.dimension_semantics<parallel>], iteration_bounds = array<i64: 2>, scalar_prefetch = 0 : i64, scratch_operands = 0 : i64, tpu.core_type = #tpu.core_type<tc>, window_params = [{transform_indices = @transform_0, window_bounds = array<i64: 1, 16, 32>}, {transform_indices = @transform_1, window_bounds = array<i64: 1, 16, 32>}, {pipeline_mode = #tpu.pipeline_mode<synchronous>, transform_indices = @transform_2, window_bounds = array<i64: 32, 128>}, {pipeline_mode = #tpu.pipeline_mode<synchronous>, transform_indices = @transform_3, window_bounds = array<i64: 1, 128>}, {pipeline_mode = #tpu.pipeline_mode<synchronous>, transform_indices = @transform_4, window_bounds = array<i64: 32, 128>}, {pipeline_mode = #tpu.pipeline_mode<synchronous>, transform_indices = @transform_5, window_bounds = array<i64: 1, 128>}, {pipeline_mode = #tpu.pipeline_mode<synchronous>, transform_indices = @transform_6, window_bounds = array<i64: 2, 128>}, {pipeline_mode = #tpu.pipeline_mode<synchronous>, transform_indices = @transform_7, window_bounds = array<i64: 2, 1>}, {transform_indices = @transform_8, window_bounds = array<i64: 1, 2, 16, 16>}]} {
    %c0 = arith.constant 0 : index
    %c0_0 = arith.constant 0 : index
    %0 = vector.load %arg3[%c0, %c0_0] : memref<32x128xbf16, #tpu.memory_space<vmem>>, vector<32x128xbf16>
    %c0_1 = arith.constant 0 : index
    %c0_2 = arith.constant 0 : index
    %1 = vector.load %arg5[%c0_1, %c0_2] : memref<32x128xbf16, #tpu.memory_space<vmem>>, vector<32x128xbf16>
    %c0_3 = arith.constant 0 : index
    %c0_4 = arith.constant 0 : index
    %2 = vector.load %arg4[%c0_3, %c0_4] : memref<1x128xf32, #tpu.memory_space<vmem>>, vector<1x128xf32>
    %c0_5 = arith.constant 0 : index
    %c0_6 = arith.constant 0 : index
    %3 = vector.load %arg6[%c0_5, %c0_6] : memref<1x128xf32, #tpu.memory_space<vmem>>, vector<1x128xf32>
    %c0_7 = arith.constant 0 : index
    %c0_8 = arith.constant 0 : index
    %4 = vector.load %arg7[%c0_7, %c0_8] : memref<2x128xf32, #tpu.memory_space<vmem>>, vector<2x128xf32>
    %c0_9 = arith.constant 0 : index
    %c0_10 = arith.constant 0 : index
    %5 = vector.load %arg8[%c0_9, %c0_10] : memref<2x1xf32, #tpu.memory_space<vmem>>, vector<2x1xf32>
    %c0_11 = arith.constant 0 : index
    %c0_12 = arith.constant 0 : index
    %c0_13 = arith.constant 0 : index
    %6 = vector.load %arg1[%c0_11, %c0_12, %c0_13] : memref<1x16x32xbf16, #tpu.memory_space<vmem>>, vector<1x16x32xbf16>
    %7 = vector.shape_cast %6 : vector<1x16x32xbf16> to vector<16x32xbf16>
    %cst = arith.constant dense<0.000000e+00> : vector<16x128xf32>
    %8 = tpu.matmul %7, %0, %cst {dimension_numbers = #tpu.dot_dimension_numbers<[1], [0], [0], [1], [0, 0, 1, 1], [], []>} : vector<16x32xbf16>, vector<32x128xbf16>, vector<16x128xf32> -> vector<16x128xf32>
    %9 = vector.broadcast %2 : vector<1x128xf32> to vector<16x128xf32>
    %10 = arith.addf %8, %9 : vector<16x128xf32>
    %cst_14 = arith.constant 0.000000e+00 : f32
    %11 = vector.broadcast %cst_14 : f32 to vector<16x128xf32>
    %12 = arith.maximumf %10, %11 : vector<16x128xf32>
    %c0_15 = arith.constant 0 : index
    %c0_16 = arith.constant 0 : index
    %c0_17 = arith.constant 0 : index
    %13 = vector.load %arg2[%c0_15, %c0_16, %c0_17] : memref<1x16x32xbf16, #tpu.memory_space<vmem>>, vector<1x16x32xbf16>
    %14 = vector.shape_cast %13 : vector<1x16x32xbf16> to vector<16x32xbf16>
    %cst_18 = arith.constant dense<0.000000e+00> : vector<16x128xf32>
    %15 = tpu.matmul %14, %1, %cst_18 {dimension_numbers = #tpu.dot_dimension_numbers<[1], [0], [0], [1], [0, 0, 1, 1], [], []>} : vector<16x32xbf16>, vector<32x128xbf16>, vector<16x128xf32> -> vector<16x128xf32>
    %16 = vector.broadcast %3 : vector<1x128xf32> to vector<16x128xf32>
    %17 = arith.addf %15, %16 : vector<16x128xf32>
    %cst_19 = arith.constant 0.000000e+00 : f32
    %18 = vector.broadcast %cst_19 : f32 to vector<16x128xf32>
    %19 = arith.maximumf %17, %18 : vector<16x128xf32>
    %20 = arith.truncf %12 : vector<16x128xf32> to vector<16x128xbf16>
    %21 = vector.extract_strided_slice %4 {offsets = [0, 0], sizes = [1, 128], strides = [1, 1]} : vector<2x128xf32> to vector<1x128xf32>
    %22 = vector.shape_cast %21 : vector<1x128xf32> to vector<128xf32>
    %23 = vector.shape_cast %22 : vector<128xf32> to vector<1x128xf32>
    %24 = vector.broadcast %23 : vector<1x128xf32> to vector<16x128xf32>
    %25 = arith.mulf %19, %24 : vector<16x128xf32>
    %26 = arith.truncf %25 : vector<16x128xf32> to vector<16x128xbf16>
    %cst_20 = arith.constant dense<0.000000e+00> : vector<16x16xf32>
    %27 = tpu.matmul %20, %26, %cst_20 {dimension_numbers = #tpu.dot_dimension_numbers<[1], [1], [0], [0], [0, 0, 1, 0], [], []>} : vector<16x128xbf16>, vector<16x128xbf16>, vector<16x16xf32> -> vector<16x16xf32>
    %28 = vector.extract_strided_slice %5 {offsets = [0, 0], sizes = [1, 1], strides = [1, 1]} : vector<2x1xf32> to vector<1x1xf32>
    %29 = vector.shape_cast %28 : vector<1x1xf32> to vector<1xf32>
    %30 = vector.shape_cast %29 : vector<1xf32> to vector<1x1xf32>
    %31 = vector.broadcast %30 : vector<1x1xf32> to vector<16x16xf32>
    %32 = arith.addf %27, %31 : vector<16x16xf32>
    %c0_21 = arith.constant 0 : index
    %c0_22 = arith.constant 0 : index
    %c0_23 = arith.constant 0 : index
    %c0_24 = arith.constant 0 : index
    %33 = vector.load %arg9[%c0_21, %c0_22, %c0_23, %c0_24] : memref<1x2x16x16xf32, #tpu.memory_space<vmem>>, vector<1x1x16x16xf32>
    %34 = vector.shape_cast %33 : vector<1x1x16x16xf32> to vector<16x16xf32>
    %35 = vector.shape_cast %32 : vector<16x16xf32> to vector<1x1x16x16xf32>
    tpu.vector_store %arg9[%c0_21, %c0_22, %c0_23, %c0_24], %35 {strides = array<i32>} : memref<1x2x16x16xf32, #tpu.memory_space<vmem>>, vector<1x1x16x16xf32>,
    %36 = vector.extract_strided_slice %4 {offsets = [1, 0], sizes = [1, 128], strides = [1, 1]} : vector<2x128xf32> to vector<1x128xf32>
    %37 = vector.shape_cast %36 : vector<1x128xf32> to vector<128xf32>
    %38 = vector.shape_cast %37 : vector<128xf32> to vector<1x128xf32>
    %39 = vector.broadcast %38 : vector<1x128xf32> to vector<16x128xf32>
    %40 = arith.mulf %19, %39 : vector<16x128xf32>
    %41 = arith.truncf %40 : vector<16x128xf32> to vector<16x128xbf16>
    %cst_25 = arith.constant dense<0.000000e+00> : vector<16x16xf32>
    %42 = tpu.matmul %20, %41, %cst_25 {dimension_numbers = #tpu.dot_dimension_numbers<[1], [1], [0], [0], [0, 0, 1, 0], [], []>} : vector<16x128xbf16>, vector<16x128xbf16>, vector<16x16xf32> -> vector<16x16xf32>
    %43 = vector.extract_strided_slice %5 {offsets = [1, 0], sizes = [1, 1], strides = [1, 1]} : vector<2x1xf32> to vector<1x1xf32>
    %44 = vector.shape_cast %43 : vector<1x1xf32> to vector<1xf32>
    %45 = vector.shape_cast %44 : vector<1xf32> to vector<1x1xf32>
    %46 = vector.broadcast %45 : vector<1x1xf32> to vector<16x16xf32>
    %47 = arith.addf %42, %46 : vector<16x16xf32>
    %c0_26 = arith.constant 0 : index
    %c1 = arith.constant 1 : index
    %c0_27 = arith.constant 0 : index
    %c0_28 = arith.constant 0 : index
    %48 = vector.load %arg9[%c0_26, %c1, %c0_27, %c0_28] : memref<1x2x16x16xf32, #tpu.memory_space<vmem>>, vector<1x1x16x16xf32>
    %49 = vector.shape_cast %48 : vector<1x1x16x16xf32> to vector<16x16xf32>
    %50 = vector.shape_cast %47 : vector<16x16xf32> to vector<1x1x16x16xf32>
    tpu.vector_store %arg9[%c0_26, %c1, %c0_27, %c0_28], %50 {strides = array<i32>} : memref<1x2x16x16xf32, #tpu.memory_space<vmem>>, vector<1x1x16x16xf32>,
    return
  }
  func.func @transform_0(%arg0: i32) -> (i32, i32, i32) {
    %c0_i32 = arith.constant 0 : i32
    %c0_i32_0 = arith.constant 0 : i32
    %c0_i32_1 = arith.constant 0 : i32
    return %arg0, %c0_i32, %c0_i32_0 : i32, i32, i32
  }
  func.func @transform_1(%arg0: i32) -> (i32, i32, i32) {
    %c0_i32 = arith.constant 0 : i32
    %c0_i32_0 = arith.constant 0 : i32
    %c0_i32_1 = arith.constant 0 : i32
    return %arg0, %c0_i32, %c0_i32_0 : i32, i32, i32
  }
  func.func @transform_2(%arg0: i32) -> (i32, i32) {
    %c0_i32 = arith.constant 0 : i32
    %c0_i32_0 = arith.constant 0 : i32
    %c0_i32_1 = arith.constant 0 : i32
    return %c0_i32, %c0_i32_0 : i32, i32
  }
  func.func @transform_3(%arg0: i32) -> (i32, i32) {
    %c0_i32 = arith.constant 0 : i32
    %c0_i32_0 = arith.constant 0 : i32
    %c0_i32_1 = arith.constant 0 : i32
    return %c0_i32, %c0_i32_0 : i32, i32
  }
  func.func @transform_4(%arg0: i32) -> (i32, i32) {
    %c0_i32 = arith.constant 0 : i32
    %c0_i32_0 = arith.constant 0 : i32
    %c0_i32_1 = arith.constant 0 : i32
    return %c0_i32, %c0_i32_0 : i32, i32
  }
  func.func @transform_5(%arg0: i32) -> (i32, i32) {
    %c0_i32 = arith.constant 0 : i32
    %c0_i32_0 = arith.constant 0 : i32
    %c0_i32_1 = arith.constant 0 : i32
    return %c0_i32, %c0_i32_0 : i32, i32
  }
  func.func @transform_6(%arg0: i32) -> (i32, i32) {
    %c0_i32 = arith.constant 0 : i32
    %c0_i32_0 = arith.constant 0 : i32
    %c0_i32_1 = arith.constant 0 : i32
    return %c0_i32, %c0_i32_0 : i32, i32
  }
  func.func @transform_7(%arg0: i32) -> (i32, i32) {
    %c0_i32 = arith.constant 0 : i32
    %c0_i32_0 = arith.constant 0 : i32
    %c0_i32_1 = arith.constant 0 : i32
    return %c0_i32, %c0_i32_0 : i32, i32
  }
  func.func @transform_8(%arg0: i32) -> (i32, i32, i32, i32) {
    %c0_i32 = arith.constant 0 : i32
    %c0_i32_0 = arith.constant 0 : i32
    %c0_i32_1 = arith.constant 0 : i32
    %c0_i32_2 = arith.constant 0 : i32
    return %arg0, %c0_i32, %c0_i32_0, %c0_i32_1 : i32, i32, i32, i32
  }
}

</mosaic_0001>

<bundles_post_ra>
// kernel: tpu_custom_call.1
= control target key start
LH: loop header
LB: loop body
LE: loop exit
PB: predicated region body
PF: predicated region fallthrough
CT: control target
= control target key end

     0   :  { %s1463_s0 = inlined_call_operand.hbm [shape: bf16[2,16,32], index: 0, kind: input, shape index: {}]   ;;  %s1464_s1 = inlined_call_operand.hbm [shape: bf16[2,16,32], index: 1, kind: input, shape index: {}]   ;;  %s1465_s2 = inlined_call_operand.hbm [shape: bf16[32,128], index: 2, kind: input, shape index: {}]   ;;  %s1466_s3 = inlined_call_operand.vmem [shape: f32[1,128], index: 3, kind: input, shape index: {}]   ;;  %s1467_s4 = inlined_call_operand.hbm [shape: bf16[32,128], index: 4, kind: input, shape index: {}]   ;;  %s1468_s5 = inlined_call_operand.vmem [shape: f32[1,128], index: 5, kind: input, shape index: {}]   ;;  %s1469_s6 = inlined_call_operand.vmem [shape: f32[2,128], index: 6, kind: input, shape index: {}]   ;;  %s1470_s7 = inlined_call_operand.vmem [shape: f32[2,1], index: 7, kind: input, shape index: {}]   ;;  %s1471_s8 = inlined_call_operand.hbm [shape: f32[2,2,16,16], index: 8, kind: output, shape index: {}]  }
   0x1   :  { %1480 = sst [smem:[#allocation18_spill]] %s1463_s0 }
   0x2   :  { %1481 = sst [smem:[#allocation19_spill]] %s1465_s2 }
   0x3   :  { %1482 = sst [smem:[#allocation20_spill]] %s1467_s4 }
   0x4   :  { %13 = vsyncpa [#allocation3], 0 }
   0x5   :  { %15 = vsyncpa [#allocation3 + $0x1], 0 }
   0x6   :  { %16 = vsyncpa [#allocation6], 0 }
   0x7   :  { %18 = vsyncpa [#allocation6 + $0x1], 0 }
   0x8   :  { %19 = vsyncpa [#allocation9], 0 }
   0x9   :  { %20 = vsyncpa [#allocation4], 0 }
   0xa   :  { %22 = vsyncpa [#allocation4 + $0x1], 0  ;;  %s1194_s27 = smov 0   ;;  %s1196_s28 = smov 0  }
   0xb   :  { %s1198_s29 = smov 0   ;;  %s1200_s30 = smov 0  }
   0xc LB: > { %1483 = sst [smem:[#allocation16_spill]] %s1132_s29  ;;  %s1215_s9 = sadd.s32 4294967295, %s1136_s30   ;;  %s1136_s30 = sphi %s1200_s30, %s1508_s30   ;;  %s1132_s29 = sphi %s1198_s29, %s1505_s29   ;;  %s1128_s28 = sphi %s1196_s28, %s1507_s28   ;;  %s1124_s27 = sphi %s1194_s27, %s1506_s27  }
   0xd   : > { %s789_s10 = sadd.s32 4294967294, %s1136_s30   ;;  %p48_p0 = scmp.ne.s32.totalorder %s1128_s28, %s1124_s27 }
   0xe   : > { %p1477_p1 = scmp.eq.s32.totalorder %s1215_s9, 0  ;;  %p224_p2 = scmp.eq.s32.totalorder %s1215_s9, 1 }
   0xf   : > { %p230_p3 = scmp.eq.s32.totalorder %s789_s10, 1  ;;  %p790_p5 = scmp.ge.s32.totalorder %s1136_s30, 1 }
  0x10   : > { %p1224_p4 = por %p1477_p1, %p48_p0  ;;  %p237_p7 = scmp.lt.s32.totalorder %s1136_s30, 3 }
  0x11   : > { %p1229_p6 = por %p230_p3, %p48_p0  ;;  %s1138_s14 = smov [#allocation7]  }
  0x12   : > { %s1484_s11 = scalar_select %p1224_p4, 1, 0 }
  0x13   : > { %s1485_s12 = scalar_select %p1229_p6, 1, 0 }
  0x14   : > { %p1234_p8 = pnand %p790_p5, %p237_p7  ;;  %s249_s15 = sshll.u32 %s1138_s14, 4  ;;  %s250_s15 = int_to_ptr.vmem [resolvable:$true] %s249_s15 }
  0x15   : > { %s1139_s17 = smov [#allocation8]   ;;  %s963_s19 = scalar_lea.vmem %s250_s15, 256 }
  0x16   : > { %p882_p9 = pneg %p1234_p8  ;;  %s265_s18 = sshll.u32 %s1139_s17, 4  ;;  %s266_s18 = int_to_ptr.vmem [resolvable:$true] %s265_s18 }
  0x17   : > { %p964_p13 = scmp.ne.s32.totalorder %s250_s15, %s963_s19  ;;  %p971_p5 = scmp.lt.s32.totalorder %s250_s15, %s250_s15 }
  0x18   : > { %p1243_p11 = pnand %p882_p9, %p1477_p1  ;;  %p972_p7 = scmp.lt.s32.totalorder %s963_s19, %s963_s19 }
  0x1a   : > { %p954_p12 = pneg %p1243_p11  ;;  %p973_p10 = por %p972_p7, %p971_p5 }
  0x1c   : > { %p966_p0 = pnand %p964_p13, %p954_p12 }
  0x1e   : > { %p967_p3 = pneg %p966_p0 }
  0x20   : > { %p974_p9 = pnand %p973_p10, %p967_p3 }
  0x22   : > { %977 = shalt.err (!%p974_p9)
}
  0x23   : > { %s1472_s20 = smov 64   ;;  %s1474_s21 = smov 4  }
  0x24   : > { %s1488_s2 = sld [smem:[#allocation19_spill]]  ;;  %s989_s24 = scalar_lea.vmem %s266_s18, 256 }
  0x25   : > { %p990_p13 = scmp.ne.s32.totalorder %s266_s18, %s989_s24  ;;  %p997_p10 = scmp.lt.s32.totalorder %s266_s18, %s266_s18 }
  0x26   : > { %p998_p3 = scmp.lt.s32.totalorder %s989_s24, %s989_s24 }
  0x27   : > { %p992_p0 = pnand %p990_p13, %p954_p12 }
  0x28   : > { %p999_p7 = por %p998_p3, %p997_p10 }
  0x29   : > { %p993_p5 = pneg %p992_p0 }
  0x2a   : > { %885 = dma.hbm_to_vmem [thread:$0]  (!%p1243_p11), %s1488_s2, 256, %s250_s15, [#allocation6], %s1472_s20, %s1472_s20, %s1474_s21  }
  0x2b   : > { %p1000_p9 = pnand %p999_p7, %p993_p5 }
  0x2d   : > { %1003 = shalt.err (!%p1000_p9)
}
  0x2e   : > { %s1489_s4 = sld [smem:[#allocation20_spill]]  ;;  %s1272_s10 = sadd.s32 1, %s1136_s30  }
  0x2f   : > { %s35_s14 = sadd.s32 1, %s1132_s29  ;;  %s32_s15 = ssub.s32 %s1136_s30, %s1272_s10 }
  0x30   : > { %p42_p12 = scmp.ne.s32.totalorder %s1132_s29, %s1128_s28  ;;  %p33_p13 = scmp.eq.s32.totalorder %s32_s15, 0 }
  0x31   : > { %p43_p0 = scmp.eq.s32.totalorder %s1136_s30, 0  ;;  %p902_p10 = scmp.lt.s32.totalorder %s1136_s30, 2 }
  0x32   : > { %p1282_p5 = por %p224_p2, %p42_p12  ;;  %s288_s19 = sand.u32 1, %s1132_s29  }
  0x33   : > { %s1288_s17 = scalar_select %p33_p13, %s1132_s29, %s35_s14  }
  0x34   : > { %888 = dma.hbm_to_vmem [thread:$0]  (!%p1243_p11), %s1489_s4, 256, %s266_s18, [#allocation9], %s1472_s20, %s1472_s20, %s1474_s21  }
  0x35   : > { %s1490_s16 = scalar_select %p1282_p5, 1, 0 }
  0x36   : > { %1491 = sst [smem:[#allocation17_spill]] %s1288_s17  ;;  %p44_p3 = por %p43_p0, %p42_p12 }
  0x37   : > { %s794_s22 = sshll.u32 %s288_s19, 3  ;;  %s823_s18 = sshll.u32 %s1136_s30, 7 }
  0x38   : > { %s1492_s0 = sld [smem:[#allocation18_spill]]  ;;  %s292_s26 = scalar_lea.vmem [#allocation2], %s794_s22 }
  0x39   : > { %s299_s15 = sshll.u32 %s292_s26, 4  ;;  %p1299_p2 = pnand %p902_p10, %p44_p3  ;;  %s1297_s15 = int_to_ptr.vmem [resolvable:$true] %s299_s15 }
  0x3a   : > { %s1306_s2 = scalar_lea.hbm %s1464_s1, %s823_s18  ;;  %s313_s23 = scalar_lea.vmem [#allocation5], %s794_s22 }
  0x3b   : > { %s1308_s24 = sshll.u32 %s313_s23, 4  ;;  %s1310_s4 = scalar_lea.sflag [#allocation3], %s288_s19  ;;  %s1341_s24 = int_to_ptr.vmem [resolvable:$true] %s1308_s24 }
  0x3c   : > { %p1006_p7 = pneg %p1299_p2 }
  0x3e   : > { %s1295_s25 = scalar_lea.hbm %s1492_s0, %s823_s18  ;;  %s1009_s21 = scalar_lea.hbm %s1492_s0, 256 }
  0x3f   : > { %s1004_s17 = scalar_lea.hbm %s1295_s25, 128  ;;  %p1010_p13 = scmp.lt.s32.totalorder %s1295_s25, %s1492_s0 }
  0x40   : > { %p1005_p11 = scmp.ne.s32.totalorder %s1295_s25, %s1004_s17  ;;  %p1011_p0 = scmp.lt.s32.totalorder %s1009_s21, %s1004_s17 }
  0x42   : > { %p1007_p9 = pnand %p1006_p7, %p1005_p11  ;;  %p1012_p10 = por %p1011_p0, %p1010_p13 }
  0x44   : > { %p1008_p12 = pneg %p1007_p9 }
  0x46   : > { %p1013_p3 = pnand %p1012_p10, %p1008_p12 }
  0x48   : > { %1016 = shalt.err (!%p1013_p3)
}
  0x49   : > { %s1017_s19 = scalar_lea.vmem %s1297_s15, 128  ;;  %s1142_s29 = smov [#allocation2]  }
  0x4a   : > { %p1018_p1 = scmp.ne.s32.totalorder %s1297_s15, %s1017_s19  ;;  %s1022_s22 = sshll.u32 %s1142_s29, 4  ;;  %s1023_s22 = int_to_ptr.vmem [resolvable:$false] %s1022_s22 }
  0x4b   : > { %s1024_s23 = scalar_lea.vmem %s1023_s22, 256  ;;  %p1025_p6 = scmp.lt.s32.totalorder %s1297_s15, %s1023_s22 }
  0x4c   : > { %p1020_p11 = pnand %p1018_p1, %p1006_p7  ;;  %p1026_p5 = scmp.lt.s32.totalorder %s1024_s23, %s1017_s19 }
  0x4e   : > { %p1021_p9 = pneg %p1020_p11  ;;  %p1027_p4 = por %p1026_p5, %p1025_p6 }
  0x50   : > { %p1028_p13 = pnand %p1027_p4, %p1021_p9 }
  0x52   : > { %1031 = shalt.err (!%p1028_p13)
}
  0x53   : > { %s1494_s17 = smov 4   ;;  %s1495_s26 = smov 64  }
  0x54   : > { %892 = dma.hbm_to_vmem [thread:$0]  (!%p1299_p2), %s1295_s25, 128, %s1297_s15, %s1310_s4, %s1495_s26, %s1495_s26, %s1494_s17  }
  0x55   : > { %s309_s21 = sand.u32 1, %s1136_s30   ;;  %s1032_s18 = scalar_lea.hbm %s1306_s2, 128 }
  0x56   : > { %s310_s14 = scalar_lea.sflag [#allocation6], %s309_s21  ;;  %p1033_p1 = scmp.ne.s32.totalorder %s1306_s2, %s1032_s18 }
  0x57   : > { %s1037_s22 = scalar_lea.hbm %s1464_s1, 256  ;;  %p1038_p5 = scmp.lt.s32.totalorder %s1306_s2, %s1464_s1 }
  0x58   : > { %p1035_p4 = pnand %p1033_p1, %p1006_p7  ;;  %p1039_p12 = scmp.lt.s32.totalorder %s1037_s22, %s1032_s18 }
  0x5a   : > { %p1036_p6 = pneg %p1035_p4  ;;  %p1040_p0 = por %p1039_p12, %p1038_p5 }
  0x5c   : > { %p1041_p10 = pnand %p1040_p0, %p1036_p6 }
  0x5e   : > { %1044 = shalt.err (!%p1041_p10)
}
  0x5f   : > { %s1045_s4 = scalar_lea.vmem %s1341_s24, 128  ;;  %s1143_s25 = smov [#allocation5]  }
  0x60   : > { %p1046_p3 = scmp.ne.s32.totalorder %s1341_s24, %s1045_s4  ;;  %s1050_s15 = sshll.u32 %s1143_s25, 4  ;;  %s1051_s15 = int_to_ptr.vmem [resolvable:$false] %s1050_s15 }
  0x61   : > { %s1052_s21 = scalar_lea.vmem %s1051_s15, 256  ;;  %p1053_p13 = scmp.lt.s32.totalorder %s1341_s24, %s1051_s15 }
  0x62   : > { %p1048_p11 = pnand %p1046_p3, %p1006_p7  ;;  %p1054_p1 = scmp.lt.s32.totalorder %s1052_s21, %s1045_s4 }
  0x64   : > { %p1049_p9 = pneg %p1048_p11  ;;  %p1055_p4 = por %p1054_p1, %p1053_p13 }
  0x66   : > { %p1056_p5 = pnand %p1055_p4, %p1049_p9 }
  0x68   : > { %1059 = shalt.err (!%p1056_p5)
}
  0x69   : > { %895 = dma.hbm_to_vmem [thread:$0]  (!%p1299_p2), %s1306_s2, 128, %s1341_s24, %s310_s14, %s1495_s26, %s1495_s26, %s1494_s17  }
  0x6a   : > { %332 = sbr.rel (%p1234_p8) target bundleno = 557 (0x22d), region = 52  ;;  %s1372_s0 = sand.u32 (!%p1234_p8), 1, %s1128_s28  }
  0x6b   : > { %s801_s18 = sshll.u32 (!%p1234_p8), %s1372_s0, 3  ;;  %s335_s19 = scalar_lea.sflag (!%p1234_p8), [#allocation3], %s1372_s0 }
  0x6c   : > { %s338_s29 = scalar_lea.vmem (!%p1234_p8), [#allocation2], %s801_s18  ;;  %p1496_p7 = scmp.ne.s32.totalorder (!%p1234_p8), %s1484_s11, 0 }
  0x6f   : > { %1103 = dma.done.wait (%p1496_p7), %s335_s19, 128  }
  0x70   : > { %1105 = vsyncadd (%p1496_p7), %s335_s19, 4294967168  ;;  %s343_s2 = sand.u32 1, %s1215_s9   ;;  %s347_s13 = scalar_lea.vmem [#allocation5], %s801_s18 }
  0x71   : > { %s344_s20 = scalar_lea.sflag [#allocation6], %s343_s2 }
  0x72   : > { %1107 = dma.done.wait (%p1496_p7), %s344_s20, 128  }
  0x73   : > { %1109 = vsyncadd (%p1496_p7), %s344_s20, 4294967168  ;;  %p1497_p8 = scmp.eq.s32.totalorder %s1215_s9, 0 }
  0x75   : > { %1111 = dma.done.wait (%p1497_p8), [#allocation6], 256   ;;  %p1498_p2 = pmov %p1497_p8 }
  0x77   : > { %1113 = vsyncadd (%p1498_p2), [#allocation6], 4294967040  ;;  %p1499_p6 = pmov %p1498_p2 }
  0x78   : > { %p1500_p12 = pmov %p1498_p2 }
  0x79   : > { %1115 = dma.done.wait (%p1499_p6), [#allocation9], 256  }
  0x7a   : > { %1117 = vsyncadd (%p1500_p12), [#allocation9], 4294967040  ;;  %v1144_v0 = vmov 0.0   ;;  %vm1145_vm0 = vmmov 0   ;;  %v946_v1 = vld [vmem:[#allocation8 + $0x8] sm:$0xff]   ;;  %v947_v2 = vld [vmem:[#allocation7 + $0x8] sm:$0xff]   ;;  %v550_v9 = vlaneseq }
  0x7b   : > { %844 = vmatprep.subr.bf16.mxu1 %v1144_v0  ;;  %836 = vmatprep.subr.bf16.mxu0 %v1144_v0  ;;  %v948_v3 = vld [vmem:[#allocation8] sm:$0xff]   ;;  %v950_v4 = vld [vmem:[#allocation7] sm:$0xff]   ;;  %vm431_vm1 = vcmask 261120   ;;  %s805_s21 = sshll.u32 %s1372_s0, 5  ;;  %vm602_vm2 = vcmask 130048   ;;  %p1501_p10 = scmp.ne.s32.totalorder %s1490_s16, 0 }
  0x7c   : > { %848 = vmatprep.mubr.msk.bf16.mxu1 %vm1145_vm0, %v1144_v0  ;;  %840 = vmatprep.mubr.msk.bf16.mxu0 %vm1145_vm0, %v1144_v0  ;;  %v949_v5 = vld [vmem:[%s347_s13] sm:$0xff]   ;;  %v951_v6 = vld [vmem:[%s338_s29] sm:$0xff]   ;;  %v551_v10 = vshrl.u32 %v550_v9, 7  ;;  %s392_s18 = scalar_lea.vmem [#allocation10], %s805_s21  ;;  %s825_s29 = sshll.u32 %s1215_s9, 9 }
  0x7d   : > { %845 = vmatpush3.bf16.msra.mxu1 %v946_v1  ;;  %837 = vmatpush3.bf16.msra.mxu0 %v947_v2  ;;  %v405_v7 = vld [vmem:[%s1470_s7] sm:$0x3]  ;;  %s674_s19 = sshll.u32 %s392_s18, 4  ;;  %s1418_s13 = scalar_lea.hbm %s1471_s8, %s825_s29  ;;  %s1412_s19 = int_to_ptr.vmem [resolvable:$true] %s674_s19 }
  0x7e   : > { %846 = vmatprep.subr.bf16.mxu1 %v1144_v0  ;;  %838 = vmatprep.subr.bf16.mxu0 %v1144_v0  ;;  %864 = vpush %v405_v7  ;;  %v612_v8 = vrot.slane %v405_v7, 1  ;;  %v811_v11 = vld [vmem:[%s1468_s5] ss:$0 sm:$0xff]  ;;  %v552_v14 = vsub.s32 0, %v551_v10  ;;  %v607_v15 = vsub.s32 1, %v551_v10  ;;  %s661_s9 = scalar_lea.sflag [#allocation4], %s1372_s0 }
  0x7f   : > { %v404_v17 = vld [vmem:[%s1469_s6] sm:$0x3]  ;;  %s1060_s11 = scalar_lea.vmem %s1412_s19, 512  ;;  %s1146_s24 = smov [#allocation10]  }
  0x80   : > { %866 = vpush %v612_v8  ;;  %v553_v22 = vrot.slane %v404_v17, %v552_v14  ;;  %v608_v23 = vrot.slane %v404_v17, %v607_v15  ;;  %v806_v27 = vld [vmem:[%s1466_s3] ss:$0 sm:$0xff]  ;;  %p1061_p0 = scmp.ne.s32.totalorder %s1412_s19, %s1060_s11  ;;  %s1064_s17 = sshll.u32 %s1146_s24, 4  ;;  %s1065_s17 = int_to_ptr.vmem [resolvable:$false] %s1064_s17 }
  0x81   : > { %847 = vmatpush3.bf16.msra.mxu1 %v948_v3  ;;  %839 = vmatpush3.bf16.msra.mxu0 %v950_v4  ;;  %s1066_s26 = scalar_lea.vmem %s1065_s17, 1024  ;;  %p1067_p9 = scmp.lt.s32.totalorder %s1412_s19, %s1065_s17 }
  0x82   : > { %858 = vmatprep.subr.bf16.mxu1 %v1144_v0  ;;  %852 = vmatprep.subr.bf16.mxu0 %v1144_v0  ;;  %p1062_p3 = pnand %p1061_p0, %p1501_p10  ;;  %p1068_p13 = scmp.lt.s32.totalorder %s1066_s26, %s1060_s11 }
  0x84   : > { %849 = vmatmul.mubr.msk.bf16.vlgmr.msra.gmra.mxu1 %vm431_vm1, %v949_v5  ;;  %841 = vmatmul.mubr.msk.bf16.vlgmr.msra.gmra.mxu0 %vm431_vm1, %v951_v6  ;;  %p1063_p11 = pneg %p1062_p3  ;;  %p1069_p1 = por %p1068_p13, %p1067_p9 }
  0x85   : > { %860 = vmatprep.mubr.msk.bf16.mxu1 %vm1145_vm0, %v1144_v0  ;;  %854 = vmatprep.mubr.msk.bf16.mxu0 %vm1145_vm0, %v1144_v0 }
  0x86   : > { %p1070_p4 = pnand %p1069_p1, %p1063_p11 }
  0xaf   : > { %s865_s25 = spop %864 }
  0xb0   : > { %v559_v41 = vstv %s865_s25 }
  0xb1   : > { %s867_s15 = spop %866 }
  0xb2   : > { %v614_v42 = vstv %s867_s15 }
 0x144   : > { %v540_v12 = vpop.f32.mrf.mxu1  ;;  %v469_v16 = vpop.f32.mrf.mxu0 }
 0x145   : > { %v541_v13 = vadd.f32 %v811_v11, %v540_v12  ;;  %v470_v34 = vadd.f32 %v806_v27, %v469_v16 }
 0x146   : > { %v850_v18 = vpop.f32.mrf.mxu1  ;;  %v842_v19 = vpop.f32.mrf.mxu0 }
 0x147   : > { %v547_v21 = vmax.f32 %v541_v13, 0.0  ;;  %v476_v38 = vmax.f32 %v470_v34, 0.0 }
 0x148   : > { %v543_v20 = vpop.f32.mrf.mxu1  ;;  %v472_v25 = vpop.f32.mrf.mxu0 }
 0x149   : > { %v544_v24 = vadd.f32 %v811_v11, %v543_v20  ;;  %v554_v30 = vmul.f32 %v553_v22, %v547_v21  ;;  %v609_v31 = vmul.f32 %v608_v23, %v547_v21  ;;  %v473_v35 = vadd.f32 %v806_v27, %v472_v25 }
 0x14a   : > { %v851_v26 = vpop.f32.mrf.mxu1  ;;  %v843_v29 = vpop.f32.mrf.mxu0 }
 0x14b   : > { %v548_v28 = vmax.f32 %v544_v24, 0.0  ;;  %v477_v39 = vmax.f32 %v473_v35, 0.0 }
 0x14d   : > { %v555_v32 = vmul.f32 %v553_v22, %v548_v28  ;;  %v610_v33 = vmul.f32 %v608_v23, %v548_v28  ;;  %v549_v40 = vpack.c.bf16 %v477_v39, %v476_v38 }
 0x14f   : > { %v556_v36 = vpack.c.bf16 %v555_v32, %v554_v30  ;;  %v611_v37 = vpack.c.bf16 %v610_v33, %v609_v31 }
 0x151   : > { %853 = vmatpush3.bf16.xpose.msra.mxu0 %v556_v36  ;;  %859 = vmatpush3.bf16.xpose.msra.mxu1 %v611_v37 }
 0x158   : > { %855 = vmatmul.mubr.bf16.vlgmr.msra.gmra.mxu0 %v549_v40  ;;  %861 = vmatmul.mubr.bf16.vlgmr.msra.gmra.mxu1 %v549_v40 }
 0x218   : > { %v595_v43 = vpop.f32.mrf.mxu0  ;;  %v650_v44 = vpop.f32.mrf.mxu1 }
 0x219   : > { %v596_v45 = vadd.f32 %v595_v43, %v559_v41  ;;  %v651_v46 = vadd.f32 %v650_v44, %v614_v42 }
 0x21a   : > { %v856_v47 = vpop.f32.mrf.mxu0  ;;  %v862_v48 = vpop.f32.mrf.mxu1 }
 0x21b   : > { %603 = vst.msk [vmem:[%s392_s18] sm:$0xff] %vm602_vm2, %v596_v45  ;;  %816 = vst.msk [vmem:[%s392_s18 + $0x10] sm:$0xff] %vm602_vm2, %v651_v46 }
 0x21c   : > { %v598_v49 = vpop.f32.mrf.mxu0  ;;  %v653_v50 = vpop.f32.mrf.mxu1 }
 0x21d   : > { %v599_v51 = vadd.f32 %v598_v49, %v559_v41  ;;  %v654_v52 = vadd.f32 %v653_v50, %v614_v42 }
 0x21e   : > { %v857_v53 = vpop.f32.mrf.mxu0  ;;  %v863_v54 = vpop.f32.mrf.mxu1 }
 0x21f   : > { %604 = vst.msk [vmem:[%s392_s18 + $0x8] sm:$0xff] %vm602_vm2, %v599_v51  ;;  %817 = vst.msk [vmem:[%s392_s18 + $0x18] sm:$0xff] %vm602_vm2, %v654_v52 }
 0x220   : > { %1073 = shalt.err (!%p1070_p4)
}
 0x221   : > { %s1074_s14 = scalar_lea.hbm %s1418_s13, 512  ;;  %s1078_s4 = scalar_lea.hbm %s1471_s8, 1024 }
 0x222   : > { %p1075_p5 = scmp.ne.s32.totalorder %s1418_s13, %s1074_s14  ;;  %p1079_p2 = scmp.lt.s32.totalorder %s1418_s13, %s1471_s8 }
 0x223   : > { %p1080_p6 = scmp.lt.s32.totalorder %s1078_s4, %s1074_s14 }
 0x224   : > { %p1076_p7 = pnand %p1075_p5, %p1501_p10 }
 0x225   : > { %p1081_p12 = por %p1080_p6, %p1079_p2 }
 0x226   : > { %p1077_p8 = pneg %p1076_p7 }
 0x228   : > { %p1082_p0 = pnand %p1081_p12, %p1077_p8 }
 0x22a   : > { %1085 = shalt.err (!%p1082_p0)
}
 0x22b   : > { %s1147_s21 = smov 128   ;;  %s1148_s18 = smov 8  }
 0x22c   : > { %880 = dma.vmem_to_hbm [thread:$0]  (%p1501_p10), %s1412_s19, 512, %s1418_s13, %s661_s9, %s1147_s21, %s1147_s21, %s1148_s18  }
 0x22d PF: > { %s689_s29 = sand.u32 1, %s1124_s27   ;;  %p1502_p3 = scmp.ne.s32.totalorder %s1485_s12, 0 }
 0x22e   : > { %p1503_p11 = scmp.ge.s32.totalorder %s1136_s30, 2  ;;  %s690_s2 = scalar_lea.sflag [#allocation4], %s689_s29 }
 0x230   : > { %p897_p9 = pnand %p1503_p11, %p1502_p3 }
 0x232   : > { %p898_p13 = pneg %p897_p9 }
 0x234   : > { %1119 = dma.done.wait (%p898_p13), %s690_s2, 512  }
 0x235   : > { %1121 = vsyncadd (%p898_p13), %s690_s2, 4294966784  ;;  %s1504_s20 = sld [smem:[#allocation16_spill]]  ;;  %p25_p1 = scmp.ge.s32.totalorder %s1272_s10, 4  }
 0x236   : > { %s1505_s29 = sld [smem:[#allocation17_spill]]  ;;  %s1506_s27 = smov %s1128_s28 }
 0x237   : > { %s1508_s30 = smov %s1272_s10  ;;  %27 = sbr.rel (!%p25_p1) target bundleno = 12 (0xc), region = 119 }
 0x23b   : > { %s1507_s28 = smov %s1504_s20 }
 0x23c   :  { %695 = vsyncpa [#allocation3], 1 }
 0x23d   :  { %697 = vsyncpa [#allocation3 + $0x1], 1 }
 0x23e   :  { %698 = vsyncpa [#allocation6], 1 }
 0x23f   :  { %700 = vsyncpa [#allocation6 + $0x1], 1 }
 0x240   :  { %701 = vsyncpa [#allocation9], 1 }
 0x241   :  { %702 = vsyncpa [#allocation4], 1 }
 0x242   :  { %704 = vsyncpa [#allocation4 + $0x1], 1 }

</bundles_post_ra>
